<compile_context>
chip_gen: v6e
topology: v6e:2x2x1
jax: 0.10.0
libtpu: 0.0.40
codegen_flags: <defaults>
</compile_context>

<pallas_src>
import functools
import math

import jax
import jax.numpy as jnp
from jax import lax
from jax.experimental import pallas as pl
from jax.experimental.pallas import tpu as pltpu

EPS = 1e-15


# ---------------------------------------------------------------------------
# Chip-aware defaults (per-input block budget, VMEM limit, #TensorCores)
# ---------------------------------------------------------------------------
@functools.lru_cache(maxsize=1)
def _chip_defaults():
    vmem_cap = 128 * 1024 * 1024
    try:
        info = pltpu.get_tpu_info()
        vmem_cap = int(getattr(info, "vmem_capacity_bytes", vmem_cap))
    except Exception:
        pass
    try:
        kind = jax.devices()[0].device_kind.lower()
    except Exception:
        kind = ""
    n_tc = 2 if ("v7" in kind or "7x" in kind) else 1
    if vmem_cap <= 80 * 1024 * 1024:
        # v7x-class: 64 MiB VMEM per TensorCore, 2 TCs, 3.2 TB/s HBM.
        n_tc = max(n_tc, 2)
        block_budget = 4 * 1024 * 1024       # per-input streamed block
        vmem_limit = 40 * 1024 * 1024
    else:
        # v5e / v6e: 128 MiB VMEM, single TensorCore, HBM-bound for f32.
        block_budget = 6 * 1024 * 1024
        vmem_limit = 64 * 1024 * 1024
    return block_budget, vmem_limit, n_tc


# ---------------------------------------------------------------------------
# In-kernel helpers
# ---------------------------------------------------------------------------
def _static_pow(base, gamma):
    """(1 - p_t) ** gamma with a *static* Python gamma.

    Small integer exponents become plain VPU multiplies (no EUP exp/log
    chain); anything else falls back to jnp.power.
    """
    g = float(gamma)
    if g == 0.0:
        return jnp.ones_like(base)
    if g.is_integer() and 0.0 < g <= 8.0:
        r = base
        for _ in range(int(g) - 1):
            r = r * base
        return r
    return jnp.power(base, g)


def _tile_sum(x):
    """Reduce a (tile_rows, c) tile to a (1, 1, 1) partial.

    Rows first (cross-vreg VPU adds), then a single small lane reduce
    (XLU slot, essentially free next to the elementwise work).
    """
    s = jnp.sum(jnp.sum(x, axis=0, keepdims=True), axis=1, keepdims=True)
    return s.reshape(1, 1, 1)


def _accumulate(loss_ref, term, *, n_rows, tile_rows, inner, ragged):
    p = pl.program_id(0)
    i = pl.program_id(1)

    @pl.when(i == 0)
    def _():
        loss_ref[...] = jnp.zeros(loss_ref.shape, loss_ref.dtype)

    if not ragged:
        loss_ref[...] += _tile_sum(term)
        return

    start = (p * inner + i) * tile_rows
    is_tail = start + tile_rows > n_rows

    @pl.when(jnp.logical_not(is_tail))
    def _():
        loss_ref[...] += _tile_sum(term)

    @pl.when(is_tail)
    def _():
        # Tail-block contents past n_rows are unspecified -> mask them out
        # (fully-masked for clamped duplicate tiles).
        row = lax.broadcasted_iota(jnp.int32, term.shape, 0)
        masked = jnp.where(row + start < n_rows, term, 0.0)
        loss_ref[...] += _tile_sum(masked)


# ---------------------------------------------------------------------------
# Kernels
# ---------------------------------------------------------------------------
def _focal_single_kernel(out_ref, tgt_ref, loss_ref, *,
                         alpha, gamma, n_rows, tile_rows, inner, ragged):
    o = out_ref[...].astype(jnp.float32)
    t = tgt_ref[...].astype(jnp.float32)
    # Well-conditioned product form (exact for binary targets; keeps
    # -log(p_t) accurate for small p_t).  EPS kept for module fidelity.
    p_t = o * t + (1.0 - t) * (1.0 - o) + EPS
    ce = -jnp.log(p_t)
    mod = _static_pow(1.0 - p_t, gamma)
    # alpha_t = alpha*t + (1-alpha)*(1-t) = (1-alpha) + (2*alpha-1)*t
    alpha_t = (1.0 - alpha) + (2.0 * alpha - 1.0) * t
    term = alpha_t * (mod * ce)
    _accumulate(loss_ref, term, n_rows=n_rows, tile_rows=tile_rows,
                inner=inner, ragged=ragged)


def _focal_alpha_list_kernel(base_ref, coef_ref, out_ref, tgt_ref, loss_ref, *,
                             gamma, n_rows, tile_rows, inner, ragged):
    o = out_ref[...].astype(jnp.float32)
    t = tgt_ref[...].astype(jnp.float32)
    p_t = o * t + (1.0 - t) * (1.0 - o) + EPS
    ce = -jnp.log(p_t)
    mod = _static_pow(1.0 - p_t, gamma)
    # alpha_t = (1-a)*t + a*(1-t) = a + (1-2a)*t ; a and (1-2a) precomputed
    # as f32 (1, c) rows in the wrapper (no per-step recompute).
    alpha_t = base_ref[...] + coef_ref[...] * t
    term = alpha_t * (mod * ce)
    _accumulate(loss_ref, term, n_rows=n_rows, tile_rows=tile_rows,
                inner=inner, ragged=ragged)


# ---------------------------------------------------------------------------
# Wrapper (the "module")
# ---------------------------------------------------------------------------
class FocalLoss:
    """JAX/Pallas port of the PyTorch FocalLoss module (forward pass)."""

    def __init__(self, alpha: float, gamma: float):
        self.alpha = float(alpha)
        self.gamma = float(gamma)
        self.alpha_list = None  # optional (C,) array

    def apply_alpha_list(self, count_classes, dataset_size: int):
        self.alpha_list = (jnp.asarray(count_classes, jnp.float32)
                           / float(dataset_size))

    def __call__(self, output, target, *, tile_rows=None, parallel_splits=None):
        output = jnp.asarray(output)
        target = jnp.asarray(target)
        assert output.shape == target.shape
        assert output.ndim >= 1

        # Stream in native dtype (bf16 / int8 / int32 stay narrow in HBM);
        # bools become int8.  Widening to f32 happens in-kernel on the VPU.
        def _prep(x):
            return x.astype(jnp.int8) if x.dtype == jnp.bool_ else x

        output = _prep(output)
        target = _prep(target)

        orig_c = output.shape[-1]

        # Flatten to (rows, cols): the loss is an elementwise sum -> exact.
        if output.ndim == 1:
            output = output[None, :]
            target = target[None, :]
        elif output.ndim > 2:
            output = output.reshape(-1, orig_c)
            target = target.reshape(-1, orig_c)
        n, c = output.shape

        # --- lane-dense relayout (metadata-only reshapes, no HBM copies) ----
        base_row = coef_row = None
        if self.alpha_list is not None:
            a = jnp.asarray(self.alpha_list, jnp.float32).reshape(-1)
            assert a.size == orig_c, "alpha_list length must match last dim"
            reps = 1
            if c % 128 != 0:
                k = 128 // math.gcd(c, 128)   # smallest k with k*c % 128 == 0
                if n % k == 0 and n >= k:
                    output = output.reshape(n // k, k * c)
                    target = target.reshape(n // k, k * c)
                    n, c = output.shape
                    reps = k
            base_row = jnp.tile(a.reshape(1, orig_c), (1, reps))
            coef_row = 1.0 - 2.0 * base_row
        elif c % 128 != 0:
            total = n * c
            new_w = 0
            for w in (2048, 1024, 512, 256, 128):   # widest lane-dense width
                if total % w == 0 and (total // w) >= 8:
                    new_w = w
                    break
            if new_w == 0:
                for w in (2048, 1024, 512, 256, 128):
                    if total % w == 0:
                        new_w = w
                        break
            if new_w:
                output = output.reshape(total // new_w, new_w)
                target = target.reshape(total // new_w, new_w)
                n, c = output.shape

        o_item = output.dtype.itemsize
        t_item = target.dtype.itemsize
        itemsize = max(o_item, t_item)

        block_budget, vmem_limit, n_tc = _chip_defaults()

        # --- row tile: as large as the per-input block budget allows --------
        if tile_rows is not None:
            budget_rows = max(1, int(tile_rows))
        else:
            budget_rows = max(8, block_budget // max(1, c * itemsize))
        if n <= budget_rows and (n % 8 == 0 or n <= 32):
            tile_rows = n                        # single block == full dims
        else:
            # multiple of 32 covers f32(8) / bf16(16) / 8-bit(32) sublanes
            tile_rows = max(32, (min(budget_rows, n) // 32) * 32)

        total_tiles = -(-n // tile_rows)

        # --- stripes: one per TensorCore on multi-TC (v7x-class) chips ------
        p_splits = n_tc if parallel_splits is None else max(1, int(parallel_splits))
        p_splits = min(p_splits, total_tiles)
        inner = -(-total_tiles // p_splits)
        ragged = (p_splits * inner * tile_rows != n)
        grid = (p_splits, inner)

        last_tile = total_tiles - 1
        if p_splits * inner > total_tiles:
            def data_map(p, i, _inner=inner, _last=last_tile):
                # clamp duplicated trailing tiles (fully masked in-kernel)
                return (jnp.minimum(p * _inner + i, _last), 0)
        else:
            def data_map(p, i, _inner=inner):
                return (p * _inner + i, 0)

        data_spec = pl.BlockSpec((tile_rows, c), data_map)
        # 3-D output so the (1, 1) trailing block dims equal the full array
        # dims (legal for any p_splits); leading dim indexed by the stripe.
        out_spec = pl.BlockSpec((1, 1, 1), lambda p, i: (p, 0, 0))
        out_shape = jax.ShapeDtypeStruct((p_splits, 1, 1), jnp.float32)

        cparams = pltpu.CompilerParams(
            dimension_semantics=("parallel", "arbitrary"),
            vmem_limit_bytes=int(vmem_limit))

        elems = n * c
        int_gamma = float(self.gamma).is_integer() and 0.0 <= self.gamma <= 8.0
        cost = pl.CostEstimate(
            flops=int(15 * elems),
            transcendentals=int((1 if int_gamma else 3) * elems),
            bytes_accessed=int(elems * (o_item + t_item) + 4 * p_splits))

        common = dict(n_rows=n, tile_rows=tile_rows, inner=inner, ragged=ragged)
        if self.alpha_list is None:
            kernel = functools.partial(_focal_single_kernel,
                                       alpha=self.alpha, gamma=self.gamma,
                                       **common)
            in_specs = [data_spec, data_spec]
            args = (output, target)
        else:
            kernel = functools.partial(_focal_alpha_list_kernel,
                                       gamma=self.gamma, **common)
            row_spec = pl.BlockSpec((1, c), lambda p, i: (0, 0))
            in_specs = [row_spec, row_spec, data_spec, data_spec]
            args = (base_row, coef_row, output, target)

        partials = pl.pallas_call(
            kernel,
            out_shape=out_shape,
            grid_spec=pltpu.PrefetchScalarGridSpec(
                num_scalar_prefetch=0,
                grid=grid,
                in_specs=in_specs,
                out_specs=out_spec),
            compiler_params=cparams,
            cost_estimate=cost,
        )(*args)

        return jnp.sum(partials)


# ---------------------------------------------------------------------------
# Pure-JAX reference (mirrors the PyTorch forward exactly, in f32)
# ---------------------------------------------------------------------------
def _ref_loss(output, target, alpha, gamma, alpha_list=None):
    o = jnp.asarray(output).astype(jnp.float32)
    t = jnp.asarray(target).astype(jnp.float32)
    inv_t = 1.0 - t
    p_t = o * t + inv_t * (1.0 - o) + EPS
    ce = -jnp.log(p_t)
    if alpha_list is None:
        alpha_t = alpha * t + (1.0 - alpha) * inv_t
    else:
        a = jnp.asarray(alpha_list, jnp.float32)
        alpha_t = (1.0 - a) * t + a * inv_t
    return jnp.sum(alpha_t * (1.0 - p_t) ** gamma * ce)


# ---------------------------------------------------------------------------
if __name__ == "__main__":
    key = jax.random.PRNGKey(0)
    k1, k2, k3, k4, k5, k6, k7 = jax.random.split(key, 7)

    N, C = 16, 128
    output = jax.random.uniform(k1, (N, C), jnp.float32, 1e-3, 1.0 - 1e-3)
    target = (jax.random.uniform(k2, (N, C), jnp.float32) > 0.8).astype(
        jnp.float32)

    # --- single-alpha path, integer gamma (fast pow path) -------------------
    fl = FocalLoss(alpha=0.25, gamma=2.0)
    loss = jax.block_until_ready(fl(output, target))
    ref = _ref_loss(output, target, 0.25, 2.0)
    assert jnp.allclose(loss, ref, rtol=1e-4, atol=1e-4), (loss, ref)

    # --- alpha_list path -----------------------------------------------------
    count_classes = jax.random.randint(k3, (C,), 1, 100).astype(jnp.float32)
    dataset_size = 1000
    fl2 = FocalLoss(alpha=0.25, gamma=2.0)
    fl2.apply_alpha_list(count_classes, dataset_size)
    loss2 = jax.block_until_ready(fl2(output, target))
    ref2 = _ref_loss(output, target, 0.25, 2.0,
                     alpha_list=count_classes / dataset_size)
    assert jnp.allclose(loss2, ref2, rtol=1e-4, atol=1e-4), (loss2, ref2)

    # --- bf16 inputs, N not multiple of 32, non-integer gamma (pow path) ----
    N3 = 40
    o3 = jax.random.uniform(k4, (N3, C), jnp.float32,
                            1e-3, 1.0 - 1e-3).astype(jnp.bfloat16)
    t3 = (jax.random.uniform(k5, (N3, C), jnp.float32) > 0.8).astype(
        jnp.bfloat16)
    fl3 = FocalLoss(alpha=0.5, gamma=1.5)
    loss3 = jax.block_until_ready(fl3(o3, t3))
    ref3 = _ref_loss(o3, t3, 0.5, 1.5)
    assert jnp.allclose(loss3, ref3, rtol=1e-4, atol=1e-4), (loss3, ref3)

    # --- >2-D input (lane-dense relayout path), single alpha ----------------
    o4 = jax.random.uniform(k4, (2, 4, 16, 16), jnp.float32, 1e-3, 1.0 - 1e-3)
    t4 = (jax.random.uniform(k5, (2, 4, 16, 16), jnp.float32) > 0.7).astype(
        jnp.float32)
    fl4 = FocalLoss(alpha=0.25, gamma=2.0)
    loss4 = jax.block_until_ready(fl4(o4, t4))
    ref4 = _ref_loss(o4, t4, 0.25, 2.0)
    assert jnp.allclose(loss4, ref4, rtol=1e-4, atol=1e-4), (loss4, ref4)

    # --- native int8 target streaming (no wrapper f32 promotion) ------------
    N5 = 48
    o5 = jax.random.uniform(k6, (N5, C), jnp.float32, 1e-3, 1.0 - 1e-3)
    t5 = (jax.random.uniform(k7, (N5, C), jnp.float32) > 0.8).astype(jnp.int8)
    fl5 = FocalLoss(alpha=0.3, gamma=2.0)
    loss5 = jax.block_until_ready(fl5(o5, t5))
    ref5 = _ref_loss(o5, t5, 0.3, 2.0)
    assert jnp.allclose(loss5, ref5, rtol=1e-4, atol=1e-4), (loss5, ref5)

    # --- ragged tail + clamped duplicate tile + 2 stripes (mask path) -------
    N6 = 70
    o6 = jax.random.uniform(k6, (N6, C), jnp.float32, 1e-3, 1.0 - 1e-3)
    t6 = (jax.random.uniform(k7, (N6, C), jnp.float32) > 0.8).astype(
        jnp.float32)
    fl6 = FocalLoss(alpha=0.25, gamma=2.0)
    loss6 = jax.block_until_ready(
        fl6(o6, t6, tile_rows=32, parallel_splits=2))
    ref6 = _ref_loss(o6, t6, 0.25, 2.0)
    assert jnp.allclose(loss6, ref6, rtol=1e-4, atol=1e-4), (loss6, ref6)

    print("KERNEL_OK")
</pallas_src>

<mosaic_0001>
module attributes {stable_mosaic.version = 11 : i64} {
  func.func @_focal_single_kernel(%arg0: i32, %arg1: i32, %arg2: memref<16x128xf32, #tpu.memory_space<vmem>>, %arg3: memref<16x128xf32, #tpu.memory_space<vmem>>, %arg4: memref<1x1x1xf32, #tpu.memory_space<vmem>>) attributes {dimension_semantics = [#tpu.dimension_semantics<parallel>, #tpu.dimension_semantics<arbitrary>], iteration_bounds = array<i64: 1, 1>, scalar_prefetch = 0 : i64, scratch_operands = 0 : i64, tpu.core_type = #tpu.core_type<tc>, window_params = [{transform_indices = @transform_0, window_bounds = array<i64: 16, 128>}, {transform_indices = @transform_1, window_bounds = array<i64: 16, 128>}, {transform_indices = @transform_2, window_bounds = array<i64: 1, 1, 1>}]} {
    %c0 = arith.constant 0 : index
    %c0_0 = arith.constant 0 : index
    %0 = vector.load %arg2[%c0, %c0_0] : memref<16x128xf32, #tpu.memory_space<vmem>>, vector<16x128xf32>
    %c0_1 = arith.constant 0 : index
    %c0_2 = arith.constant 0 : index
    %1 = vector.load %arg3[%c0_1, %c0_2] : memref<16x128xf32, #tpu.memory_space<vmem>>, vector<16x128xf32>
    %2 = arith.mulf %0, %1 : vector<16x128xf32>
    %cst = arith.constant 1.000000e+00 : f32
    %3 = vector.broadcast %cst : f32 to vector<16x128xf32>
    %4 = arith.subf %3, %1 : vector<16x128xf32>
    %cst_3 = arith.constant 1.000000e+00 : f32
    %5 = vector.broadcast %cst_3 : f32 to vector<16x128xf32>
    %6 = arith.subf %5, %0 : vector<16x128xf32>
    %7 = arith.mulf %4, %6 : vector<16x128xf32>
    %8 = arith.addf %2, %7 : vector<16x128xf32>
    %cst_4 = arith.constant 1.000000e-15 : f32
    %9 = vector.broadcast %cst_4 : f32 to vector<16x128xf32>
    %10 = arith.addf %8, %9 : vector<16x128xf32>
    %11 = math.log %10 : vector<16x128xf32>
    %cst_5 = arith.constant 0.000000e+00 : f32
    %12 = vector.broadcast %cst_5 : f32 to vector<16x128xf32>
    %13 = arith.subf %12, %11 : vector<16x128xf32>
    %cst_6 = arith.constant 1.000000e+00 : f32
    %14 = vector.broadcast %cst_6 : f32 to vector<16x128xf32>
    %15 = arith.subf %14, %10 : vector<16x128xf32>
    %16 = arith.mulf %15, %15 : vector<16x128xf32>
    %cst_7 = arith.constant -5.000000e-01 : f32
    %17 = vector.broadcast %cst_7 : f32 to vector<16x128xf32>
    %18 = arith.mulf %17, %1 : vector<16x128xf32>
    %cst_8 = arith.constant 7.500000e-01 : f32
    %19 = vector.broadcast %cst_8 : f32 to vector<16x128xf32>
    %20 = arith.addf %19, %18 : vector<16x128xf32>
    %21 = arith.mulf %16, %13 : vector<16x128xf32>
    %22 = arith.mulf %20, %21 : vector<16x128xf32>
    %c0_i32 = arith.constant 0 : i32
    %23 = arith.cmpi eq, %arg1, %c0_i32 : i32
    %24 = arith.extui %23 : i1 to i32
    %c0_i32_9 = arith.constant 0 : i32
    %25 = arith.cmpi ne, %24, %c0_i32_9 : i32
    scf.if %25 {
      %cst_18 = arith.constant 0.000000e+00 : f32
      %34 = vector.broadcast %cst_18 : f32 to vector<1x1x1xf32>
      %c0_19 = arith.constant 0 : index
      %c0_20 = arith.constant 0 : index
      %c0_21 = arith.constant 0 : index
      %35 = vector.load %arg4[%c0_19, %c0_20, %c0_21] : memref<1x1x1xf32, #tpu.memory_space<vmem>>, vector<1x1x1xf32>
      tpu.vector_store %arg4[%c0_19, %c0_20, %c0_21], %34 {strides = array<i32>} : memref<1x1x1xf32, #tpu.memory_space<vmem>>, vector<1x1x1xf32>,
    } else {
    }
    %c0_10 = arith.constant 0 : index
    %c0_11 = arith.constant 0 : index
    %c0_12 = arith.constant 0 : index
    %26 = vector.load %arg4[%c0_10, %c0_11, %c0_12] : memref<1x1x1xf32, #tpu.memory_space<vmem>>, vector<1x1x1xf32>
    %cst_13 = arith.constant dense<0.000000e+00> : vector<128xf32>
    %27 = vector.multi_reduction <add>, %22, %cst_13 [0] : vector<16x128xf32> to vector<128xf32>
    %28 = vector.shape_cast %27 : vector<128xf32> to vector<1x128xf32>
    %cst_14 = arith.constant dense<0.000000e+00> : vector<1xf32>
    %29 = vector.multi_reduction <add>, %28, %cst_14 [1] : vector<1x128xf32> to vector<1xf32>
    %30 = vector.shape_cast %29 : vector<1xf32> to vector<1x1xf32>
    %31 = vector.shape_cast %30 : vector<1x1xf32> to vector<1x1x1xf32>
    %32 = arith.addf %26, %31 : vector<1x1x1xf32>
    %c0_15 = arith.constant 0 : index
    %c0_16 = arith.constant 0 : index
    %c0_17 = arith.constant 0 : index
    %33 = vector.load %arg4[%c0_15, %c0_16, %c0_17] : memref<1x1x1xf32, #tpu.memory_space<vmem>>, vector<1x1x1xf32>
    tpu.vector_store %arg4[%c0_15, %c0_16, %c0_17], %32 {strides = array<i32>} : memref<1x1x1xf32, #tpu.memory_space<vmem>>, vector<1x1x1xf32>,
    return
  }
  func.func @transform_0(%arg0: i32, %arg1: i32) -> (i32, i32) {
    %c1_i32 = arith.constant 1 : i32
    %0 = arith.muli %arg0, %c1_i32 : i32
    %1 = arith.addi %0, %arg1 : i32
    %c0_i32 = arith.constant 0 : i32
    %c0_i32_0 = arith.constant 0 : i32
    return %1, %c0_i32 : i32, i32
  }
  func.func @transform_1(%arg0: i32, %arg1: i32) -> (i32, i32) {
    %c1_i32 = arith.constant 1 : i32
    %0 = arith.muli %arg0, %c1_i32 : i32
    %1 = arith.addi %0, %arg1 : i32
    %c0_i32 = arith.constant 0 : i32
    %c0_i32_0 = arith.constant 0 : i32
    return %1, %c0_i32 : i32, i32
  }
  func.func @transform_2(%arg0: i32, %arg1: i32) -> (i32, i32, i32) {
    %c0_i32 = arith.constant 0 : i32
    %c0_i32_0 = arith.constant 0 : i32
    %c0_i32_1 = arith.constant 0 : i32
    return %arg0, %c0_i32, %c0_i32_0 : i32, i32, i32
  }
}

</mosaic_0001>

<bundles_post_ra>
// kernel: tpu_custom_call.1
= control target key start
LH: loop header
LB: loop body
LE: loop exit
PB: predicated region body
PF: predicated region fallthrough
CT: control target
= control target key end

     0   :  { %7 = vsyncpa [#allocation3], 0  ;;  %s229_s0 = inlined_call_operand.hbm [shape: f32[16,128], index: 0, kind: input, shape index: {}]   ;;  %s230_s1 = inlined_call_operand.hbm [shape: f32[16,128], index: 1, kind: input, shape index: {}]   ;;  %s231_s2 = inlined_call_operand.hbm [shape: f32[1,1,1], index: 2, kind: output, shape index: {}]  }
   0x1   :  { %8 = vsyncpa [#allocation6], 0 }
   0x2   :  { %9 = vsyncpa [#allocation4], 0  ;;  %s197_s9 = smov [#allocation2]  }
   0x3   :  { %s19_s10 = sshll.u32 %s197_s9, 4  ;;  %s20_s10 = int_to_ptr.vmem [resolvable:$true] %s19_s10 }
   0x4   :  { %s139_s11 = scalar_lea.vmem %s20_s10, 256  ;;  %p144_p1 = scmp.lt.s32.totalorder %s20_s10, %s20_s10 }
   0x5   :  { %p140_p0 = scmp.ne.s32.totalorder %s20_s10, %s139_s11  ;;  %p145_p2 = scmp.lt.s32.totalorder %s139_s11, %s139_s11 }
   0x7   :  { %p146_p3 = por %p145_p2, %p144_p1 }
   0x9   :  { %p147_p4 = pnand %p146_p3, %p140_p0 }
   0xb   :  { %150 = shalt.err (!%p147_p4)
}
   0xc   :  { %s198_s12 = smov 128   ;;  %s199_s13 = smov 8  }
   0xd   :  { %25 = dma.hbm_to_vmem [thread:$0]  %s229_s0, 256, %s20_s10, [#allocation3], %s198_s12, %s198_s12, %s199_s13  }
   0xe   :  { %s200_s16 = smov [#allocation5]  }
   0xf   :  { %s35_s17 = sshll.u32 %s200_s16, 4  ;;  %s36_s17 = int_to_ptr.vmem [resolvable:$true] %s35_s17 }
  0x10   :  { %s159_s18 = scalar_lea.vmem %s36_s17, 256  ;;  %p164_p6 = scmp.lt.s32.totalorder %s36_s17, %s36_s17 }
  0x11   :  { %p160_p5 = scmp.ne.s32.totalorder %s36_s17, %s159_s18  ;;  %p165_p7 = scmp.lt.s32.totalorder %s159_s18, %s159_s18 }
  0x13   :  { %p166_p8 = por %p165_p7, %p164_p6 }
  0x15   :  { %p167_p9 = pnand %p166_p8, %p160_p5 }
  0x17   :  { %170 = shalt.err (!%p167_p9)
}
  0x18   :  { %41 = dma.hbm_to_vmem [thread:$0]  %s230_s1, 256, %s36_s17, [#allocation6], %s198_s12, %s198_s12, %s199_s13  }
  0x19   :  { %191 = dma.done.wait [#allocation3], 256  }
  0x1a   :  { %192 = vsyncadd [#allocation3], 4294967040 }
  0x1b   :  { %193 = dma.done.wait [#allocation6], 256  }
  0x1c   :  { %194 = vsyncadd [#allocation6], 4294967040  ;;  %vm90_vm0 = vcmask 0   ;;  %v201_v0 = vmov 0.0   ;;  %v52_v1 = vld [vmem:[#allocation2] sm:$0xff]  ;;  %v53_v2 = vld [vmem:[#allocation2 + $0x8] sm:$0xff] }
  0x1d   :  { %91 = vst.msk [vmem:[#allocation7] sm:$0x1] %vm90_vm0, %v201_v0  ;;  %v54_v3 = vld [vmem:[#allocation5] sm:$0xff]  ;;  %v55_v4 = vld [vmem:[#allocation5 + $0x8] sm:$0xff]  ;;  %v60_v7 = vsub.f32 1.0, %v52_v1  ;;  %v61_v8 = vsub.f32 1.0, %v53_v2 }
  0x1e   :  { %v56_v5 = vmul.f32 %v54_v3, %v52_v1  ;;  %v58_v6 = vsub.f32 1.0, %v54_v3  ;;  %v57_v9 = vmul.f32 %v55_v4, %v53_v2  ;;  %v59_v10 = vsub.f32 1.0, %v55_v4  ;;  %s202_s0 = smov [#allocation7]  }
  0x1f   :  { %v78_v19 = vmul.f32 -0.5, %v54_v3  ;;  %v79_v21 = vmul.f32 -0.5, %v55_v4  ;;  %s111_s1 = sshll.u32 %s202_s0, 4  ;;  %s112_s1 = int_to_ptr.vmem [resolvable:$true] %s111_s1 }
  0x20   :  { %v62_v11 = vmul.f32 %v60_v7, %v58_v6  ;;  %v63_v12 = vmul.f32 %v61_v8, %v59_v10  ;;  %s171_s21 = scalar_lea.vmem %s112_s1, 16  ;;  %s175_s22 = scalar_lea.vmem %s112_s1, 32 }
  0x21   :  { %v80_v28 = vadd.f32 0.75, %v78_v19  ;;  %v81_v30 = vadd.f32 0.75, %v79_v21  ;;  %p172_p10 = scmp.ne.s32.totalorder %s112_s1, %s171_s21  ;;  %p176_p11 = scmp.lt.s32.totalorder %s112_s1, %s112_s1 }
  0x22   :  { %v64_v13 = vadd.f32 %v62_v11, %v56_v5  ;;  %v65_v14 = vadd.f32 %v63_v12, %v57_v9  ;;  %p177_p12 = scmp.lt.s32.totalorder %s175_s22, %s171_s21 }
  0x24   :  { %v66_v15 = vadd.f32 1e-15, %v64_v13  ;;  %v67_v16 = vadd.f32 1e-15, %v65_v14  ;;  %v92_v42 = vld [vmem:[#allocation7] sm:$0x1]  ;;  %p178_p13 = por %p177_p12, %p176_p11 }
  0x26   :  { %127 = vlog2.f32 %v66_v15  ;;  %v74_v17 = vsub.f32 1.0, %v66_v15  ;;  %v75_v18 = vsub.f32 1.0, %v67_v16  ;;  %p179_p0 = pnand %p178_p13, %p172_p10 }
  0x27   :  { %129 = vlog2.f32 %v67_v16 }
  0x28   :  { %v76_v24 = vmul.f32 %v74_v17, %v74_v17  ;;  %v77_v26 = vmul.f32 %v75_v18, %v75_v18 }
  0x33   :  { %v128_v20 = vpop.eup %127 }
  0x34   :  { %v130_v22 = vpop.eup %129  ;;  %v69_v23 = vmul.f32 0.6931472, %v128_v20 }
  0x35   :  { %v71_v25 = vmul.f32 0.6931472, %v130_v22 }
  0x36   :  { %v72_v27 = vsub.f32 0.0, %v69_v23 }
  0x37   :  { %v73_v29 = vsub.f32 0.0, %v71_v25 }
  0x38   :  { %v82_v31 = vmul.f32 %v76_v24, %v72_v27 }
  0x39   :  { %v83_v32 = vmul.f32 %v77_v26, %v73_v29 }
  0x3a   :  { %v84_v33 = vmul.f32 %v82_v31, %v80_v28 }
  0x3b   :  { %v85_v34 = vmul.f32 %v83_v32, %v81_v30 }
  0x3d   :  { %v93_v35 = vadd.f32 %v85_v34, %v84_v33 }
  0x3f   :  { %v94_v36 = vrot.slane %v93_v35, 4 }
  0x41   :  { %v95_v37 = vadd.f32 %v94_v36, %v93_v35 }
  0x43   :  { %v96_v38 = vrot.slane %v95_v37, 2 }
  0x45   :  { %v97_v39 = vadd.f32 %v96_v38, %v95_v37 }
  0x47   :  { %v98_v40 = vrot.slane %v97_v39, 1 }
  0x49   :  { %v99_v41 = vadd.f32 %v98_v40, %v97_v39 }
  0x4b   :  { %100 = vadd.xlane.f32.xlu0 %v99_v41 }
  0xd4   :  { %v101_v43 = vpop.xlane.xlu0 %100 }
  0xd5   :  { %v102_v44 = vadd.f32 %v101_v43, %v92_v42 }
  0xd7   :  { %104 = vst.msk [vmem:[#allocation7] sm:$0x1] %vm90_vm0, %v102_v44 }
  0xd8   :  { %182 = shalt.err (!%p179_p0)
}
  0xd9   :  { %114 = dma.vmem_to_hbm [thread:$0]  %s112_s1, 16, %s231_s2, [#allocation4]  }
  0xda   :  { %195 = dma.done.wait [#allocation4], 16  }
  0xdb   :  { %196 = vsyncadd [#allocation4], 4294967280 }
  0xdc   :  { %118 = vsyncpa [#allocation3], 1 }
  0xdd   :  { %119 = vsyncpa [#allocation6], 1 }
  0xde   :  { %120 = vsyncpa [#allocation4], 1 }

</bundles_post_ra>
